<compile_context>
chip_gen: v6e
topology: v6e:2x2x1
jax: 0.10.0
libtpu: 0.0.40
codegen_flags: <defaults>
</compile_context>

<pallas_src>
import functools

import jax
import jax.numpy as jnp
from jax.experimental import pallas as pl
from jax.experimental.pallas import tpu as pltpu


LANE = 128
MAX_TILE_P = 32 * 1024              # cap on pixel columns per grid step
MIN_SPLIT_TILE_P = 8 * 1024         # only split a scale if each tile stays >= this
VMEM_BUDGET_BYTES = 20 * 1024 * 1024   # tile-sizing budget (double-buffered in+out)
VMEM_LIMIT_BYTES = 32 * 1024 * 1024    # scoped VMEM limit (safe on v5e/v6e/v7x)


def _round_up(x, m):
    return ((x + m - 1) // m) * m


def _cdiv(a, b):
    return (a + b - 1) // b


def _choose_tiling(n, c_in, c_out, p, itemsize):
    """Pick (tile_p, num_tiles) for one scale's (N, C, P) slab."""
    # Double-buffered input + output block bytes per pixel column (all batches).
    bytes_per_col = 2 * n * (c_in + c_out) * itemsize
    vmem_cols = max(LANE, (VMEM_BUDGET_BYTES // bytes_per_col) // LANE * LANE)
    tile_cap = min(MAX_TILE_P, vmem_cols)

    if p <= tile_cap and p < 2 * MIN_SPLIT_TILE_P:
        # Small scale: one full-extent block -> no padding, minimal grid steps
        # (best for v5e/v6e's single serial TensorCore).
        return p, 1

    # Large scale: split into near-equal, lane-aligned tiles.  At least two
    # tiles so v7x's two TensorCores both get work on the "parallel" axis;
    # near-equal sizing keeps the ragged-tail waste to < 128 columns.
    num_tiles = max(_cdiv(p, tile_cap), 2)
    tile_p = _round_up(_cdiv(p, num_tiles), LANE)
    return tile_p, _cdiv(p, tile_p)


def _pointwise_conv_relu_kernel(x_ref, w_ref, b_ref, o_ref):
    # x_ref: (N, C_in, TILE_P)   w_ref: (C_out, C_in)
    # b_ref: (C_out, TILE_P)     o_ref: (N, C_out, TILE_P)
    w = w_ref[...]
    b = b_ref[...]
    # Static (small) batch loop: all batches share one grid step, so N x more
    # bytes move per ~0.35 us step overhead.  K = C_in is tiny, so the MXU
    # push is free filler under DMA slack; the kernel is HBM-bandwidth-bound.
    for bi in range(x_ref.shape[0]):
        y = jnp.dot(w, x_ref[bi], preferred_element_type=jnp.float32)
        o_ref[bi] = jnp.maximum(y + b, 0.0).astype(o_ref.dtype)


@functools.partial(jax.jit, static_argnames=("tile_p", "num_tiles"))
def _conv_relu_scale(x, w, b_tile, *, tile_p, num_tiles):
    """x: (N, C_in, P); w: (C_out, C_in); b_tile: (C_out, tile_p)."""
    n, c_in, p = x.shape
    c_out = w.shape[0]
    return pl.pallas_call(
        _pointwise_conv_relu_kernel,
        out_shape=jax.ShapeDtypeStruct((n, c_out, p), x.dtype),
        grid_spec=pltpu.PrefetchScalarGridSpec(
            num_scalar_prefetch=0,
            grid=(num_tiles,),
            in_specs=[
                pl.BlockSpec((n, c_in, tile_p), lambda i: (0, 0, i)),
                pl.BlockSpec((c_out, c_in), lambda i: (0, 0)),    # VMEM-resident
                pl.BlockSpec((c_out, tile_p), lambda i: (0, 0)),  # VMEM-resident
            ],
            out_specs=pl.BlockSpec((n, c_out, tile_p), lambda i: (0, 0, i)),
        ),
        compiler_params=pltpu.CompilerParams(
            dimension_semantics=("parallel",),
            vmem_limit_bytes=VMEM_LIMIT_BYTES,
        ),
    )(x, w, b_tile)


def decoder_module_wrapper_forward(features, inputs, weight, bias):
    """Pallas equivalent of DecoderModuleWrapper.forward.

    Args:
        features: list of NCHW feature maps at different resolutions.
        inputs: original inputs (ignored, matching the PyTorch module).
        weight: (C_out, C_in) = torch 1x1 conv weight[:, :, 0, 0].
        bias: (C_out,) conv bias.

    Returns:
        list of new NCHW feature maps (wrapped module applied to each scale).
    """
    del inputs  # ignored, same as the PyTorch wrapper

    c_out, c_in = weight.shape
    new_features = []
    for feat in features:
        n, c, h, w = feat.shape
        assert c == c_in
        p = h * w
        x = feat.reshape(n, c, p)  # free: NCHW already has H*W contiguous
        tile_p, num_tiles = _choose_tiling(n, c_in, c_out, p, feat.dtype.itemsize)
        # Lane-dense bias tile: constant index map -> DMA'd to VMEM once per
        # call; in-kernel add becomes a plain VPU elementwise add.
        b_tile = jnp.broadcast_to(bias.reshape(c_out, 1), (c_out, tile_p))
        y = _conv_relu_scale(x, weight, b_tile, tile_p=tile_p, num_tiles=num_tiles)
        new_features.append(y.reshape(n, c_out, h, w))
    return new_features


if __name__ == "__main__":
    key = jax.random.PRNGKey(0)
    k_w, k_b, k_f0, k_f1, k_in = jax.random.split(key, 5)

    N, C = 2, 8  # wrapped module is Conv2d(C, C, 1) + ReLU

    # Deterministic synthetic parameters (torch layout would be
    # weight: (C_out, C_in, 1, 1), bias: (C_out,)).
    weight = jax.random.normal(k_w, (C, C), dtype=jnp.float32) * 0.1  # (C_out, C_in)
    bias = jax.random.normal(k_b, (C,), dtype=jnp.float32) * 0.1

    # Multi-scale features, NCHW.
    features = [
        jax.random.normal(k_f0, (N, C, 16, 16), dtype=jnp.float32),
        jax.random.normal(k_f1, (N, C, 8, 8), dtype=jnp.float32),
    ]
    inputs = [jax.random.normal(k_in, (N, 3, 32, 32), dtype=jnp.float32)]

    outs = decoder_module_wrapper_forward(features, inputs, weight, bias)
    outs = [jax.block_until_ready(o) for o in outs]

    # Correctness check vs. plain-JAX reference of the same wrapped module.
    for feat, out in zip(features, outs):
        ref = jnp.maximum(
            jnp.einsum("nchw,oc->nohw", feat, weight) + bias[None, :, None, None],
            0.0,
        )
        assert out.shape == ref.shape
        assert jnp.allclose(out, ref, atol=1e-5, rtol=1e-5)

    print("KERNEL_OK")
</pallas_src>

<mosaic_0001>
module attributes {stable_mosaic.version = 11 : i64} {
  func.func @_pointwise_conv_relu_kernel(%arg0: i32, %arg1: memref<2x8x256xf32, #tpu.memory_space<vmem>>, %arg2: memref<8x8xf32, #tpu.memory_space<vmem>>, %arg3: memref<8x256xf32, #tpu.memory_space<vmem>>, %arg4: memref<2x8x256xf32, #tpu.memory_space<vmem>>) attributes {dimension_semantics = [#tpu.dimension_semantics<parallel>], iteration_bounds = array<i64: 1>, scalar_prefetch = 0 : i64, scratch_operands = 0 : i64, tpu.core_type = #tpu.core_type<tc>, window_params = [{transform_indices = @transform_0, window_bounds = array<i64: 2, 8, 256>}, {pipeline_mode = #tpu.pipeline_mode<synchronous>, transform_indices = @transform_1, window_bounds = array<i64: 8, 8>}, {pipeline_mode = #tpu.pipeline_mode<synchronous>, transform_indices = @transform_2, window_bounds = array<i64: 8, 256>}, {transform_indices = @transform_3, window_bounds = array<i64: 2, 8, 256>}]} {
    %c0 = arith.constant 0 : index
    %c0_0 = arith.constant 0 : index
    %0 = vector.load %arg2[%c0, %c0_0] : memref<8x8xf32, #tpu.memory_space<vmem>>, vector<8x8xf32>
    %c0_1 = arith.constant 0 : index
    %c0_2 = arith.constant 0 : index
    %1 = vector.load %arg3[%c0_1, %c0_2] : memref<8x256xf32, #tpu.memory_space<vmem>>, vector<8x256xf32>
    %c0_3 = arith.constant 0 : index
    %c0_4 = arith.constant 0 : index
    %c0_5 = arith.constant 0 : index
    %2 = vector.load %arg1[%c0_3, %c0_4, %c0_5] : memref<2x8x256xf32, #tpu.memory_space<vmem>>, vector<1x8x256xf32>
    %3 = vector.shape_cast %2 : vector<1x8x256xf32> to vector<8x256xf32>
    %cst = arith.constant dense<0.000000e+00> : vector<8x256xf32>
    %4 = tpu.matmul %0, %3, %cst {dimension_numbers = #tpu.dot_dimension_numbers<[1], [0], [0], [1], [0, 0, 1, 1], [], []>} : vector<8x8xf32>, vector<8x256xf32>, vector<8x256xf32> -> vector<8x256xf32>
    %5 = arith.addf %4, %1 : vector<8x256xf32>
    %cst_6 = arith.constant 0.000000e+00 : f32
    %6 = vector.broadcast %cst_6 : f32 to vector<8x256xf32>
    %7 = arith.maximumf %5, %6 : vector<8x256xf32>
    %c0_7 = arith.constant 0 : index
    %c0_8 = arith.constant 0 : index
    %c0_9 = arith.constant 0 : index
    %8 = vector.load %arg4[%c0_7, %c0_8, %c0_9] : memref<2x8x256xf32, #tpu.memory_space<vmem>>, vector<1x8x256xf32>
    %9 = vector.shape_cast %8 : vector<1x8x256xf32> to vector<8x256xf32>
    %10 = vector.shape_cast %7 : vector<8x256xf32> to vector<1x8x256xf32>
    tpu.vector_store %arg4[%c0_7, %c0_8, %c0_9], %10 {strides = array<i32>} : memref<2x8x256xf32, #tpu.memory_space<vmem>>, vector<1x8x256xf32>,
    %c1 = arith.constant 1 : index
    %c0_10 = arith.constant 0 : index
    %c0_11 = arith.constant 0 : index
    %11 = vector.load %arg1[%c1, %c0_10, %c0_11] : memref<2x8x256xf32, #tpu.memory_space<vmem>>, vector<1x8x256xf32>
    %12 = vector.shape_cast %11 : vector<1x8x256xf32> to vector<8x256xf32>
    %cst_12 = arith.constant dense<0.000000e+00> : vector<8x256xf32>
    %13 = tpu.matmul %0, %12, %cst_12 {dimension_numbers = #tpu.dot_dimension_numbers<[1], [0], [0], [1], [0, 0, 1, 1], [], []>} : vector<8x8xf32>, vector<8x256xf32>, vector<8x256xf32> -> vector<8x256xf32>
    %14 = arith.addf %13, %1 : vector<8x256xf32>
    %cst_13 = arith.constant 0.000000e+00 : f32
    %15 = vector.broadcast %cst_13 : f32 to vector<8x256xf32>
    %16 = arith.maximumf %14, %15 : vector<8x256xf32>
    %c1_14 = arith.constant 1 : index
    %c0_15 = arith.constant 0 : index
    %c0_16 = arith.constant 0 : index
    %17 = vector.load %arg4[%c1_14, %c0_15, %c0_16] : memref<2x8x256xf32, #tpu.memory_space<vmem>>, vector<1x8x256xf32>
    %18 = vector.shape_cast %17 : vector<1x8x256xf32> to vector<8x256xf32>
    %19 = vector.shape_cast %16 : vector<8x256xf32> to vector<1x8x256xf32>
    tpu.vector_store %arg4[%c1_14, %c0_15, %c0_16], %19 {strides = array<i32>} : memref<2x8x256xf32, #tpu.memory_space<vmem>>, vector<1x8x256xf32>,
    return
  }
  func.func @transform_0(%arg0: i32) -> (i32, i32, i32) {
    %c0_i32 = arith.constant 0 : i32
    %c0_i32_0 = arith.constant 0 : i32
    %c0_i32_1 = arith.constant 0 : i32
    return %c0_i32, %c0_i32_0, %arg0 : i32, i32, i32
  }
  func.func @transform_1(%arg0: i32) -> (i32, i32) {
    %c0_i32 = arith.constant 0 : i32
    %c0_i32_0 = arith.constant 0 : i32
    %c0_i32_1 = arith.constant 0 : i32
    return %c0_i32, %c0_i32_0 : i32, i32
  }
  func.func @transform_2(%arg0: i32) -> (i32, i32) {
    %c0_i32 = arith.constant 0 : i32
    %c0_i32_0 = arith.constant 0 : i32
    %c0_i32_1 = arith.constant 0 : i32
    return %c0_i32, %c0_i32_0 : i32, i32
  }
  func.func @transform_3(%arg0: i32) -> (i32, i32, i32) {
    %c0_i32 = arith.constant 0 : i32
    %c0_i32_0 = arith.constant 0 : i32
    %c0_i32_1 = arith.constant 0 : i32
    return %c0_i32, %c0_i32_0, %arg0 : i32, i32, i32
  }
}

</mosaic_0001>

<bundles_post_ra>
// kernel: _conv_relu_scale.1
= control target key start
LH: loop header
LB: loop body
LE: loop exit
PB: predicated region body
PF: predicated region fallthrough
CT: control target
= control target key end

     0   :  { %8 = vsyncpa [#allocation3], 0  ;;  %s373_s0 = inlined_call_operand.hbm [shape: f32[2,8,256], index: 0, kind: input, shape index: {}]   ;;  %s374_s1 = inlined_call_operand.hbm [shape: f32[8,8], index: 1, kind: input, shape index: {}]   ;;  %s375_s2 = inlined_call_operand.hbm [shape: f32[8,256], index: 2, kind: input, shape index: {}]   ;;  %s376_s3 = inlined_call_operand.hbm [shape: f32[2,8,256], index: 3, kind: output, shape index: {}]  }
   0x1   :  { %9 = vsyncpa [#allocation6], 0 }
   0x2   :  { %10 = vsyncpa [#allocation4], 0  ;;  %s328_s12 = smov [#allocation5]   ;;  %s329_s14 = smov [#allocation2]  }
   0x3   :  { %s29_s13 = sshll.u32 %s328_s12, 4  ;;  %s16_s15 = sshll.u32 %s329_s14, 4  ;;  %s30_s13 = int_to_ptr.vmem [resolvable:$true] %s29_s13  ;;  %s17_s15 = int_to_ptr.vmem [resolvable:$true] %s16_s15 }
   0x4   :  { %s250_s16 = scalar_lea.vmem %s30_s13, 128  ;;  %p255_p1 = scmp.lt.s32.totalorder %s30_s13, %s30_s13 }
   0x5   :  { %p251_p0 = scmp.ne.s32.totalorder %s30_s13, %s250_s16  ;;  %p256_p2 = scmp.lt.s32.totalorder %s250_s16, %s250_s16 }
   0x7   :  { %p257_p3 = por %p256_p2, %p255_p1 }
   0x9   :  { %p258_p4 = pnand %p257_p3, %p251_p0 }
   0xb   :  { %261 = shalt.err (!%p258_p4)
}
   0xc   :  { %32 = dma.hbm_to_vmem [thread:$0]  %s374_s1, 128, %s30_s13, [#allocation6]  }
   0xd   :  { %s270_s19 = scalar_lea.vmem %s17_s15, 512  ;;  %p275_p6 = scmp.lt.s32.totalorder %s17_s15, %s17_s15 }
   0xe   :  { %p271_p5 = scmp.ne.s32.totalorder %s17_s15, %s270_s19  ;;  %p276_p7 = scmp.lt.s32.totalorder %s270_s19, %s270_s19 }
  0x10   :  { %p277_p8 = por %p276_p7, %p275_p6 }
  0x12   :  { %p278_p9 = pnand %p277_p8, %p271_p5 }
  0x14   :  { %281 = shalt.err (!%p278_p9)
}
  0x15   :  { %s330_s20 = smov 256   ;;  %s331_s21 = smov 16  }
  0x16   :  { %22 = dma.hbm_to_vmem [thread:$0]  %s373_s0, 512, %s17_s15, [#allocation3], %s330_s20, %s330_s20, %s331_s21  }
  0x17   :  { %s332_s24 = smov [#allocation7]  }
  0x18   :  { %s39_s25 = sshll.u32 %s332_s24, 4  ;;  %s40_s25 = int_to_ptr.vmem [resolvable:$true] %s39_s25 }
  0x19   :  { %s290_s1 = scalar_lea.vmem %s40_s25, 256  ;;  %p295_p11 = scmp.lt.s32.totalorder %s40_s25, %s40_s25 }
  0x1a   :  { %p291_p10 = scmp.ne.s32.totalorder %s40_s25, %s290_s1  ;;  %p296_p12 = scmp.lt.s32.totalorder %s290_s1, %s290_s1 }
  0x1c   :  { %p297_p13 = por %p296_p12, %p295_p11 }
  0x1e   :  { %p298_p0 = pnand %p297_p13, %p291_p10 }
  0x20   :  { %301 = shalt.err (!%p298_p0)
}
  0x21   :  { %42 = dma.hbm_to_vmem [thread:$0]  %s375_s2, 256, %s40_s25, [#allocation6]  }
  0x22   :  { %322 = dma.done.wait [#allocation3], 512  }
  0x23   :  { %323 = vsyncadd [#allocation3], 4294966784 }
  0x24   :  { %324 = dma.done.wait [#allocation6], 384  }
  0x25   :  { %325 = vsyncadd [#allocation6], 4294966912  ;;  %v333_v0 = vmov 0.0   ;;  %v56_v1 = vld [vmem:[#allocation2 + $0x8] sm:$0xff]  ;;  %v138_v2 = vld [vmem:[#allocation2 + $0x18] sm:$0xff]  ;;  %vm57_vm0 = vcmask 64512  }
  0x26   :  { %125 = vmatprep.mubr.f32.mxu0 %v333_v0  ;;  %203 = vmatprep.mubr.f32.mxu1 %v333_v0  ;;  %v55_v3 = vld [vmem:[#allocation2] sm:$0xff]  ;;  %v137_v4 = vld [vmem:[#allocation2 + $0x10] sm:$0xff]  ;;  %v53_v6 = vld [vmem:[#allocation7] sm:$0xff]  ;;  %s334_s0 = smov [#allocation8]  }
  0x27   :  { %91 = vmatprep.subr.mxu0 %v56_v1  ;;  %169 = vmatprep.subr.mxu1 %v138_v2  ;;  %v52_v5 = vld [vmem:[#allocation5] sm:$0xff]  ;;  %v54_v9 = vld [vmem:[#allocation7 + $0x8] sm:$0xff]  ;;  %s220_s2 = sshll.u32 %s334_s0, 4  ;;  %s221_s2 = int_to_ptr.vmem [resolvable:$true] %s220_s2 }
  0x28   :  { %92 = vmatpush1.msra.mxu0 %v55_v3  ;;  %170 = vmatpush1.msra.mxu1 %v137_v4  ;;  %s302_s28 = scalar_lea.vmem %s221_s2, 512  ;;  %p307_p2 = scmp.lt.s32.totalorder %s221_s2, %s221_s2 }
  0x29   :  { %233 = vmatmul.mubr.msk.f32.vlgmr.msra.gmra.mxu0 %vm57_vm0, %v52_v5  ;;  %234 = vmatmul.mubr.msk.f32.vlgmr.msra.gmra.mxu1 %vm57_vm0, %v52_v5  ;;  %p303_p1 = scmp.ne.s32.totalorder %s221_s2, %s302_s28  ;;  %p308_p3 = scmp.lt.s32.totalorder %s302_s28, %s302_s28 }
  0x2b   :  { %p309_p4 = por %p308_p3, %p307_p2 }
  0x2d   :  { %p310_p5 = pnand %p309_p4, %p303_p1 }
  0xe9   :  { %v127_v7 = vpop.f32.mrf.mxu0  ;;  %v205_v8 = vpop.f32.mrf.mxu1 }
  0xea   :  { %v128_v10 = vadd.f32 %v127_v7, %v53_v6  ;;  %v206_v11 = vadd.f32 %v205_v8, %v53_v6 }
  0xeb   :  { %v129_v12 = vpop.f32.mrf.mxu0  ;;  %v207_v13 = vpop.f32.mrf.mxu1 }
  0xec   :  { %v132_v14 = vmax.f32 %v128_v10, 0.0  ;;  %v210_v15 = vmax.f32 %v206_v11, 0.0  ;;  %v130_v16 = vadd.f32 %v129_v12, %v54_v9  ;;  %v208_v17 = vadd.f32 %v207_v13, %v54_v9 }
  0xee   :  { %134 = vst [vmem:[#allocation8] sm:$0xff] %v132_v14  ;;  %213 = vst [vmem:[#allocation8 + $0x10] sm:$0xff] %v210_v15  ;;  %v133_v18 = vmax.f32 %v130_v16, 0.0  ;;  %v211_v19 = vmax.f32 %v208_v17, 0.0 }
  0xf0   :  { %135 = vst [vmem:[#allocation8 + $0x8] sm:$0xff] %v133_v18  ;;  %214 = vst [vmem:[#allocation8 + $0x18] sm:$0xff] %v211_v19 }
  0xf1   :  { %313 = shalt.err (!%p310_p5)
}
  0xf2   :  { %226 = dma.vmem_to_hbm [thread:$0]  %s221_s2, 512, %s376_s3, [#allocation4], %s330_s20, %s330_s20, %s331_s21  }
  0xf3   :  { %326 = dma.done.wait [#allocation4], 512  }
  0xf4   :  { %327 = vsyncadd [#allocation4], 4294966784 }
  0xf5   :  { %230 = vsyncpa [#allocation3], 1 }
  0xf6   :  { %231 = vsyncpa [#allocation6], 1 }
  0xf7   :  { %232 = vsyncpa [#allocation4], 1 }

</bundles_post_ra>
